<compile_context>
chip_gen: v5e
topology: v5e:2x2
jax: 0.10.0
libtpu: 0.0.40
codegen_flags: <defaults>
</compile_context>

<pallas_src>
import jax
import jax.numpy as jnp
import numpy as np
from jax import lax
from jax.experimental import pallas as pl
from jax.experimental.pallas import tpu as pltpu


def _gridding_kernel(xc_ref, yzc_ref, pts_ref, out_ref):
    """One (batch, point-tile) grid step.

    xc_ref : (1, L)       f32  x grid coordinates
    yzc_ref: (2, L*L)     f32  row 0 = y coordinate per lane, row 1 = z coord
    pts_ref: (1, TN, 3)   f32  scaled point tile
    out_ref: (1, L, L*L)  f32  output-resident accumulator over the point axis
    """
    k = pl.program_id(1)

    @pl.when(k == 0)
    def _():
        out_ref[...] = jnp.zeros_like(out_ref)

    pts = pts_ref[0]                                   # (TN, 3)
    px = pts[:, 0:1]                                   # (TN, 1)
    py = pts[:, 1:2]
    pz = pts[:, 2:3]

    # Padding / filtered points: coordinate sum == 0 -> weight 0.
    mask = ((px + py + pz) != 0.0).astype(jnp.float32)

    xc = xc_ref[...]                                   # (1, L)
    yc = yzc_ref[0:1, :]                               # (1, L*L)
    zc = yzc_ref[1:2, :]                               # (1, L*L)

    # Per-axis tent weights (f32 VPU math, v5e-safe), cast to bf16 for the MXU.
    wx = (jnp.maximum(1.0 - jnp.abs(px - xc), 0.0) * mask).astype(jnp.bfloat16)
    wy = jnp.maximum(1.0 - jnp.abs(py - yc), 0.0)      # (TN, L*L)
    wz = jnp.maximum(1.0 - jnp.abs(pz - zc), 0.0)      # (TN, L*L)
    wyz = (wy * wz).astype(jnp.bfloat16)               # (TN, L*L)

    # Contract over the point (sublane) axis of both operands -> (L, L*L).
    partial = lax.dot_general(
        wx, wyz,
        dimension_numbers=(((0,), (0,)), ((), ())),
        preferred_element_type=jnp.float32,
    )
    out_ref[0] += partial


def _round_up(x: int, m: int) -> int:
    return ((x + m - 1) // m) * m


def gridding_forward(ptcloud: jax.Array, scale: int, *, tn: int = 256) -> jax.Array:
    """Equivalent of Gridding(scale).forward(ptcloud).

    ptcloud: (B, N, 3) float32 in roughly [-1, 1].
    returns: (B, L**3) float32, L = 2*(scale//2), flat index x*L*L + y*L + z.
    """
    half = scale // 2
    L = 2 * half
    min_c = float(-half)

    pts = ptcloud.astype(jnp.float32) * float(half - 1)
    B, N, _ = pts.shape

    # Point tile: bounded so per-step temporaries (~TN*L*L floats) stay small
    # even at production GRNet sizes (L<=64), and well under v7x's 64 MiB VMEM.
    TN = min(tn, _round_up(N, 8))
    N_pad = _round_up(N, TN)
    if N_pad != N:
        # Zero-padded points have coordinate sum == 0 and are masked in-kernel.
        pts = jnp.pad(pts, ((0, 0), (0, N_pad - N), (0, 0)))
    K = N_pad // TN

    # Precomputed coordinate tables (replace in-kernel iota + integer div/mod).
    x_coord = (jnp.arange(L, dtype=jnp.float32) + min_c).reshape(1, L)
    yz = jnp.arange(L * L, dtype=jnp.int32)
    y_coord = (yz // L).astype(jnp.float32) + min_c
    z_coord = (yz % L).astype(jnp.float32) + min_c
    yz_coord = jnp.stack([y_coord, z_coord], axis=0)    # (2, L*L)

    grid_out = pl.pallas_call(
        _gridding_kernel,
        out_shape=jax.ShapeDtypeStruct((B, L, L * L), jnp.float32),
        grid=(B, K),
        in_specs=[
            pl.BlockSpec((1, L), lambda b, k: (0, 0)),
            pl.BlockSpec((2, L * L), lambda b, k: (0, 0)),
            pl.BlockSpec((1, TN, 3), lambda b, k: (b, k, 0)),
        ],
        out_specs=pl.BlockSpec((1, L, L * L), lambda b, k: (b, 0, 0)),
        compiler_params=pltpu.CompilerParams(
            dimension_semantics=("parallel", "arbitrary"),
            vmem_limit_bytes=48 * 1024 * 1024,
        ),
    )(x_coord, yz_coord, pts)

    return grid_out.reshape(B, L * L * L)


def gridding_reference(ptcloud: np.ndarray, scale: int) -> np.ndarray:
    """Pure-numpy reference mirroring the CUDA gridding.forward semantics."""
    half = scale // 2
    L = 2 * half
    pts = np.asarray(ptcloud, np.float64) * (half - 1)
    B, N, _ = pts.shape
    out = np.zeros((B, L, L, L), np.float64)
    for b in range(B):
        for n in range(N):
            x, y, z = pts[b, n]
            if x + y + z == 0.0:
                continue
            lx, ly, lz = int(np.floor(x)), int(np.floor(y)), int(np.floor(z))
            for cx in (lx, lx + 1):
                for cy in (ly, ly + 1):
                    for cz in (lz, lz + 1):
                        w = ((1.0 - abs(x - cx))
                             * (1.0 - abs(y - cy))
                             * (1.0 - abs(z - cz)))
                        ix, iy, iz = cx + half, cy + half, cz + half
                        if 0 <= ix < L and 0 <= iy < L and 0 <= iz < L:
                            out[b, ix, iy, iz] += w
    return out.reshape(B, L * L * L).astype(np.float32)


if __name__ == "__main__":
    # Small deterministic example: batch=2, 128 points, scale=16 -> 16^3 grid.
    B, N, SCALE = 2, 128, 16
    key = jax.random.PRNGKey(0)
    pts = jax.random.uniform(key, (B, N, 3), jnp.float32, minval=-1.0, maxval=1.0)
    # Emulate padding points (coords all zero) that the module filters out.
    pts = pts.at[:, N - 16:, :].set(0.0)

    grid = gridding_forward(pts, SCALE)
    grid = jax.block_until_ready(grid)

    ref = gridding_reference(np.asarray(pts), SCALE)
    np.testing.assert_allclose(np.asarray(grid), ref, rtol=2e-2, atol=2e-2)

    assert grid.shape == (B, SCALE * SCALE * SCALE)
    print("KERNEL_OK")
</pallas_src>

<mosaic_0001>
module attributes {stable_mosaic.version = 11 : i64} {
  func.func @_gridding_kernel(%arg0: i32, %arg1: i32, %arg2: memref<1x16xf32, #tpu.memory_space<vmem>>, %arg3: memref<2x256xf32, #tpu.memory_space<vmem>>, %arg4: memref<1x128x3xf32, #tpu.memory_space<vmem>>, %arg5: memref<1x16x256xf32, #tpu.memory_space<vmem>>) attributes {dimension_semantics = [#tpu.dimension_semantics<parallel>, #tpu.dimension_semantics<arbitrary>], iteration_bounds = array<i64: 2, 1>, scalar_prefetch = 0 : i64, scratch_operands = 0 : i64, tpu.core_type = #tpu.core_type<tc>, window_params = [{pipeline_mode = #tpu.pipeline_mode<synchronous>, transform_indices = @transform_0, window_bounds = array<i64: 1, 16>}, {pipeline_mode = #tpu.pipeline_mode<synchronous>, transform_indices = @transform_1, window_bounds = array<i64: 2, 256>}, {transform_indices = @transform_2, window_bounds = array<i64: 1, 128, 3>}, {transform_indices = @transform_3, window_bounds = array<i64: 1, 16, 256>}]} {
    %c0_i32 = arith.constant 0 : i32
    %0 = arith.cmpi eq, %arg1, %c0_i32 : i32
    %1 = arith.extui %0 : i1 to i32
    %c0_i32_0 = arith.constant 0 : i32
    %2 = arith.cmpi ne, %1, %c0_i32_0 : i32
    scf.if %2 {
      %cst_21 = arith.constant 0.000000e+00 : f32
      %53 = vector.broadcast %cst_21 : f32 to vector<1x16x256xf32>
      %c0_22 = arith.constant 0 : index
      %c0_23 = arith.constant 0 : index
      %c0_24 = arith.constant 0 : index
      %54 = vector.load %arg5[%c0_22, %c0_23, %c0_24] : memref<1x16x256xf32, #tpu.memory_space<vmem>>, vector<1x16x256xf32>
      tpu.vector_store %arg5[%c0_22, %c0_23, %c0_24], %53 {strides = array<i32>} : memref<1x16x256xf32, #tpu.memory_space<vmem>>, vector<1x16x256xf32>,
    } else {
    }
    %c0 = arith.constant 0 : index
    %c0_1 = arith.constant 0 : index
    %c0_2 = arith.constant 0 : index
    %3 = vector.load %arg4[%c0, %c0_1, %c0_2] : memref<1x128x3xf32, #tpu.memory_space<vmem>>, vector<1x128x3xf32>
    %4 = vector.shape_cast %3 : vector<1x128x3xf32> to vector<128x3xf32>
    %5 = vector.extract_strided_slice %4 {offsets = [0, 0], sizes = [128, 1], strides = [1, 1]} : vector<128x3xf32> to vector<128x1xf32>
    %6 = vector.extract_strided_slice %4 {offsets = [0, 1], sizes = [128, 1], strides = [1, 1]} : vector<128x3xf32> to vector<128x1xf32>
    %7 = vector.extract_strided_slice %4 {offsets = [0, 2], sizes = [128, 1], strides = [1, 1]} : vector<128x3xf32> to vector<128x1xf32>
    %8 = arith.addf %5, %6 : vector<128x1xf32>
    %9 = arith.addf %8, %7 : vector<128x1xf32>
    %cst = arith.constant 0.000000e+00 : f32
    %10 = vector.broadcast %cst : f32 to vector<128x1xf32>
    %11 = arith.cmpf one, %9, %10 : vector<128x1xf32>
    %12 = arith.extui %11 : vector<128x1xi1> to vector<128x1xi32>
    %13 = arith.sitofp %12 : vector<128x1xi32> to vector<128x1xf32>
    %c0_3 = arith.constant 0 : index
    %c0_4 = arith.constant 0 : index
    %14 = vector.load %arg2[%c0_3, %c0_4] : memref<1x16xf32, #tpu.memory_space<vmem>>, vector<1x16xf32>
    %c0_5 = arith.constant 0 : index
    %c0_6 = arith.constant 0 : index
    %15 = vector.load %arg3[%c0_5, %c0_6] : memref<2x256xf32, #tpu.memory_space<vmem>>, vector<1x256xf32>
    %c1 = arith.constant 1 : index
    %c0_7 = arith.constant 0 : index
    %16 = vector.load %arg3[%c1, %c0_7] : memref<2x256xf32, #tpu.memory_space<vmem>>, vector<1x256xf32>
    %17 = vector.broadcast %5 : vector<128x1xf32> to vector<128x16xf32>
    %18 = vector.broadcast %14 : vector<1x16xf32> to vector<128x16xf32>
    %19 = arith.subf %17, %18 : vector<128x16xf32>
    %20 = math.absf %19 : vector<128x16xf32>
    %cst_8 = arith.constant 1.000000e+00 : f32
    %21 = vector.broadcast %cst_8 : f32 to vector<128x16xf32>
    %22 = arith.subf %21, %20 : vector<128x16xf32>
    %cst_9 = arith.constant 0.000000e+00 : f32
    %23 = vector.broadcast %cst_9 : f32 to vector<128x16xf32>
    %24 = arith.maximumf %22, %23 : vector<128x16xf32>
    %25 = vector.broadcast %13 : vector<128x1xf32> to vector<128x16xf32>
    %26 = arith.mulf %24, %25 : vector<128x16xf32>
    %27 = arith.truncf %26 : vector<128x16xf32> to vector<128x16xbf16>
    %28 = vector.broadcast %6 : vector<128x1xf32> to vector<128x256xf32>
    %29 = vector.broadcast %15 : vector<1x256xf32> to vector<128x256xf32>
    %30 = arith.subf %28, %29 : vector<128x256xf32>
    %31 = math.absf %30 : vector<128x256xf32>
    %cst_10 = arith.constant 1.000000e+00 : f32
    %32 = vector.broadcast %cst_10 : f32 to vector<128x256xf32>
    %33 = arith.subf %32, %31 : vector<128x256xf32>
    %cst_11 = arith.constant 0.000000e+00 : f32
    %34 = vector.broadcast %cst_11 : f32 to vector<128x256xf32>
    %35 = arith.maximumf %33, %34 : vector<128x256xf32>
    %36 = vector.broadcast %7 : vector<128x1xf32> to vector<128x256xf32>
    %37 = vector.broadcast %16 : vector<1x256xf32> to vector<128x256xf32>
    %38 = arith.subf %36, %37 : vector<128x256xf32>
    %39 = math.absf %38 : vector<128x256xf32>
    %cst_12 = arith.constant 1.000000e+00 : f32
    %40 = vector.broadcast %cst_12 : f32 to vector<128x256xf32>
    %41 = arith.subf %40, %39 : vector<128x256xf32>
    %cst_13 = arith.constant 0.000000e+00 : f32
    %42 = vector.broadcast %cst_13 : f32 to vector<128x256xf32>
    %43 = arith.maximumf %41, %42 : vector<128x256xf32>
    %44 = arith.mulf %35, %43 : vector<128x256xf32>
    %45 = arith.truncf %44 : vector<128x256xf32> to vector<128x256xbf16>
    %cst_14 = arith.constant dense<0.000000e+00> : vector<16x256xf32>
    %46 = tpu.matmul %27, %45, %cst_14 {dimension_numbers = #tpu.dot_dimension_numbers<[0], [0], [1], [1], [0, 1, 1, 1], [], []>} : vector<128x16xbf16>, vector<128x256xbf16>, vector<16x256xf32> -> vector<16x256xf32>
    %c0_15 = arith.constant 0 : index
    %c0_16 = arith.constant 0 : index
    %c0_17 = arith.constant 0 : index
    %47 = vector.load %arg5[%c0_15, %c0_16, %c0_17] : memref<1x16x256xf32, #tpu.memory_space<vmem>>, vector<1x16x256xf32>
    %48 = vector.shape_cast %47 : vector<1x16x256xf32> to vector<16x256xf32>
    %49 = arith.addf %48, %46 : vector<16x256xf32>
    %c0_18 = arith.constant 0 : index
    %c0_19 = arith.constant 0 : index
    %c0_20 = arith.constant 0 : index
    %50 = vector.load %arg5[%c0_18, %c0_19, %c0_20] : memref<1x16x256xf32, #tpu.memory_space<vmem>>, vector<1x16x256xf32>
    %51 = vector.shape_cast %50 : vector<1x16x256xf32> to vector<16x256xf32>
    %52 = vector.shape_cast %49 : vector<16x256xf32> to vector<1x16x256xf32>
    tpu.vector_store %arg5[%c0_18, %c0_19, %c0_20], %52 {strides = array<i32>} : memref<1x16x256xf32, #tpu.memory_space<vmem>>, vector<1x16x256xf32>,
    return
  }
  func.func @transform_0(%arg0: i32, %arg1: i32) -> (i32, i32) {
    %c0_i32 = arith.constant 0 : i32
    %c0_i32_0 = arith.constant 0 : i32
    %c0_i32_1 = arith.constant 0 : i32
    return %c0_i32, %c0_i32_0 : i32, i32
  }
  func.func @transform_1(%arg0: i32, %arg1: i32) -> (i32, i32) {
    %c0_i32 = arith.constant 0 : i32
    %c0_i32_0 = arith.constant 0 : i32
    %c0_i32_1 = arith.constant 0 : i32
    return %c0_i32, %c0_i32_0 : i32, i32
  }
  func.func @transform_2(%arg0: i32, %arg1: i32) -> (i32, i32, i32) {
    %c0_i32 = arith.constant 0 : i32
    %c0_i32_0 = arith.constant 0 : i32
    return %arg0, %arg1, %c0_i32 : i32, i32, i32
  }
  func.func @transform_3(%arg0: i32, %arg1: i32) -> (i32, i32, i32) {
    %c0_i32 = arith.constant 0 : i32
    %c0_i32_0 = arith.constant 0 : i32
    %c0_i32_1 = arith.constant 0 : i32
    return %arg0, %c0_i32, %c0_i32_0 : i32, i32, i32
  }
}

</mosaic_0001>

<bundles_post_ra>
// kernel: tpu_custom_call.1
= control target key start
LH: loop header
LB: loop body
LE: loop exit
PB: predicated region body
PF: predicated region fallthrough
CT: control target
= control target key end

     0   :  { %8 = vsyncpa [#allocation3], 0  ;;  %s2084_s0 = inlined_call_operand.vmem [shape: f32[1,16], index: 0, kind: input, shape index: {}]   ;;  %s2085_s1 = inlined_call_operand.vmem [shape: f32[2,256], index: 1, kind: input, shape index: {}]   ;;  %s2086_s2 = inlined_call_operand.vmem [shape: f32[2,128,3], index: 2, kind: input, shape index: {}]   ;;  %s2087_s3 = inlined_call_operand.hbm [shape: f32[2,16,256], index: 3, kind: output, shape index: {}]  }
   0x1   :  { %10 = vsyncpa [#allocation3 + $0x1], 0  ;;  %s1506_s12 = smov 0   ;;  %s1508_s13 = smov 0  }
   0x2   :  { %s1510_s14 = smov 0   ;;  %s1512_s15 = smov 0  }
   0x3   :  { %s1514_s16 = smov 0   ;;  %s1516_s17 = smov 0  }
   0x4 LB: > { %s1242_s18 = sadd.s32 4294967295, %s1476_s17   ;;  %s1243_s19 = sadd.s32 4294967294, %s1476_s17   ;;  %s1476_s17 = sphi %s1516_s17, %s16_s17   ;;  %s1472_s16 = sphi %s1514_s16, %s2097_s16   ;;  %s1468_s15 = sphi %s1512_s15, %s2096_s15   ;;  %s1464_s14 = sphi %s1510_s14, %s2095_s14   ;;  %s1460_s13 = sphi %s1508_s13, %s2094_s13   ;;  %s1456_s12 = sphi %s1506_s12, %s2093_s12  }
   0x5   : > { %s28_s20 = sadd.s32 1, %s1472_s16  ;;  %s105_s21 = sadd.s32 1, %s1464_s14 }
   0x6   : > { %p30_p0 = scmp.ge.s32.totalorder %s28_s20, 2  ;;  %p115_p1 = scmp.ne.s32.totalorder %s1464_s14, %s1460_s13 }
   0x7   : > { %p116_p2 = scmp.eq.s32.totalorder %s1242_s18, 1  ;;  %p121_p3 = scmp.ne.s32.totalorder %s1460_s13, %s1456_s12 }
   0x8   : > { %s2099_s20 = smov (%p30_p0, %s28_s20), 0  ;;  %p122_p5 = scmp.eq.s32.totalorder %s1243_s19, 1 }
   0x9   : > { %p1546_p4 = por %p116_p2, %p115_p1  ;;  %s102_s23 = ssub.s32 %s1472_s16, %s2099_s20 }
   0xa   : > { %p1246_p6 = scmp.ge.s32.totalorder %s1476_s17, 1  ;;  %p103_p7 = scmp.eq.s32.totalorder %s102_s23, 0 }
   0xb   : > { %p1553_p8 = por %p122_p5, %p121_p3  ;;  %p159_p9 = scmp.lt.s32.totalorder %s1476_s17, 3 }
   0xc   : > { %s1559_s25 = scalar_select %p103_p7, %s1464_s14, %s105_s21  }
   0xd   : > { %p160_p10 = pnand %p1246_p6, %p159_p9 }
   0xe   : > { %p188_p11 = scmp.lt.s32.totalorder (!%p160_p10), %s1468_s15, 1  ;;  %s1478_s4 = smov (!%p160_p10), 127  }
   0xf   : > { %163 = sbr.rel (%p160_p10) target bundleno = 632 (0x278), region = 32  ;;  %s1479_s5 = smov (!%p160_p10), 126  }
  0x10   : > { %s184_s18 = sand.u32 (!%p160_p10), 1, %s1460_s13   ;;  %s1273_s21 = sshll.u32 (!%p160_p10), %s1468_s15, 5 }
  0x11   : > { %s1247_s19 = sshll.u32 (!%p160_p10), %s184_s18, 5  ;;  %s1162_s28 = scalar_lea.hbm (!%p160_p10), %s2087_s3, %s1273_s21 }
  0x12   : > { %s186_s23 = scalar_lea.vmem (!%p160_p10), [#allocation2], %s1247_s19  ;;  %s1418_s8 = scalar_lea.hbm (!%p160_p10), %s2087_s3, 64 }
  0x13   : > { %s1163_s29 = sshll.u32 (!%p160_p10), %s186_s23, 4  ;;  %s1164_s29 = int_to_ptr.vmem [resolvable:$true] %s1163_s29 }
  0x14   : > { %s189_s26 = scalar_select %p188_p11, %s1468_s15, 1  ;;  %v1480_v16 = vmov 0   ;;  %v1481_v41 = vmov 0.0  }
  0x15   : > { %1342 = vset.pattern.permute.xlu1 %v1480_v16  ;;  %1341 = vset.pattern.permute.xlu0 %v1480_v16 }
  0x16   : > { %s1272_s27 = sshll.u32 %s189_s26, 7  ;;  %1340 = vset.pattern.permute.xlu2 %v1480_v16 }
  0x17   : > { %s1566_s30 = scalar_lea.vmem %s2086_s2, %s1272_s27 }
  0x18   : > { %v1569_v0 = vld [vmem:[%s1566_s30 + $0x20] sm:$0xff]  ;;  %v1572_v1 = vld [vmem:[%s1566_s30 + $0x10] sm:$0xff]  ;;  %v1584_v3 = vld [vmem:[%s1566_s30 + $0x28] sm:$0xff] }
  0x19   : > { %v1575_v2 = vld [vmem:[%s1566_s30] sm:$0xff]  ;;  %245 = vrot.lane.b32.xlu2 %v1569_v0, %s1478_s4  ;;  %241 = vrot.lane.b32.xlu1 %v1572_v1, %s1478_s4  ;;  %v1587_v4 = vld [vmem:[%s1566_s30 + $0x18] sm:$0xff] }
  0x1a   : > { %237 = vrot.lane.b32.xlu0 %v1575_v2, %s1478_s4  ;;  %v1590_v5 = vld [vmem:[%s1566_s30 + $0x8] sm:$0xff]  ;;  %v1599_v6 = vld [vmem:[%s1566_s30 + $0x40] sm:$0xff]  ;;  %v1602_v7 = vld [vmem:[%s1566_s30 + $0x38] sm:$0xff] }
  0x1b   : > { %v1605_v8 = vld [vmem:[%s1566_s30 + $0x30] sm:$0xff]  ;;  %v1614_v9 = vld [vmem:[%s1566_s30 + $0x58] sm:$0xff]  ;;  %v1620_v11 = vld [vmem:[%s1566_s30 + $0x48] sm:$0xff] }
  0x1c   : > { %v1617_v10 = vld [vmem:[%s1566_s30 + $0x50] sm:$0xff]  ;;  %v1632_v13 = vld [vmem:[%s1566_s30 + $0x68] sm:$0xff]  ;;  %v1635_v14 = vld [vmem:[%s1566_s30 + $0x60] sm:$0xff] }
  0x1d   : > { %v1629_v12 = vld [vmem:[%s1566_s30 + $0x70] sm:$0xff]  ;;  %v1644_v15 = vld [vmem:[%s1566_s30 + $0x78] sm:$0xff]  ;;  %s1165_s30 = sshll.u32 %s1162_s28, 4  ;;  %s1166_s30 = int_to_ptr.hbm [resolvable:$true] %s1165_s30 }
  0x21   : > { %247 = vrot.lane.b32.xlu2 %v1584_v3, %s1478_s4  ;;  %243 = vrot.lane.b32.xlu1 %v1587_v4, %s1478_s4 }
  0x22   : > { %239 = vrot.lane.b32.xlu0 %v1590_v5, %s1478_s4 }
  0x29   : > { %253 = vrot.lane.b32.xlu2 %v1599_v6, %s1478_s4  ;;  %251 = vrot.lane.b32.xlu1 %v1602_v7, %s1478_s4 }
  0x2a   : > { %249 = vrot.lane.b32.xlu0 %v1605_v8, %s1478_s4 }
  0x31   : > { %259 = vrot.lane.b32.xlu2 %v1614_v9, %s1478_s4  ;;  %257 = vrot.lane.b32.xlu1 %v1617_v10, %s1478_s4 }
  0x32   : > { %255 = vrot.lane.b32.xlu0 %v1620_v11, %s1478_s4 }
  0x39   : > { %265 = vrot.lane.b32.xlu2 %v1629_v12, %s1478_s4  ;;  %263 = vrot.lane.b32.xlu1 %v1632_v13, %s1478_s4 }
  0x3a   : > { %261 = vrot.lane.b32.xlu0 %v1635_v14, %s1478_s4 }
  0x41   : > { %303 = vrot.lane.b32.xlu2 %v1590_v5, %s1479_s5  ;;  %301 = vrot.lane.b32.xlu1 %v1575_v2, %s1479_s5 }
  0x42   : > { %267 = vrot.lane.b32.xlu0 %v1644_v15, %s1478_s4  ;;  %s1151_s4 = scalar_lea.sflag [#allocation3], %s184_s18 }
  0x49   : > { %309 = vrot.lane.b32.xlu2 %v1569_v0, %s1479_s5  ;;  %307 = vrot.lane.b32.xlu1 %v1587_v4, %s1479_s5 }
  0x4a   : > { %305 = vrot.lane.b32.xlu0 %v1572_v1, %s1479_s5 }
  0x51   : > { %315 = vrot.lane.b32.xlu2 %v1602_v7, %s1479_s5  ;;  %313 = vrot.lane.b32.xlu1 %v1605_v8, %s1479_s5 }
  0x52   : > { %311 = vrot.lane.b32.xlu0 %v1584_v3, %s1479_s5 }
  0x59   : > { %321 = vrot.lane.b32.xlu2 %v1617_v10, %s1479_s5  ;;  %319 = vrot.lane.b32.xlu1 %v1620_v11, %s1479_s5 }
  0x5a   : > { %317 = vrot.lane.b32.xlu0 %v1599_v6, %s1479_s5 }
  0x61   : > { %327 = vrot.lane.b32.xlu2 %v1632_v13, %s1479_s5  ;;  %325 = vrot.lane.b32.xlu1 %v1635_v14, %s1479_s5 }
  0x62   : > { %323 = vrot.lane.b32.xlu0 %v1614_v9, %s1479_s5 }
  0x69   : > { %331 = vrot.lane.b32.xlu1 %v1644_v15, %s1479_s5  ;;  %418 = vperm.xlu2 %1340, %v1575_v2  }
  0x6a   : > { %329 = vrot.lane.b32.xlu0 %v1629_v12, %s1479_s5  ;;  %s1412_s5 = sshra.s32 %s1166_s30, 4  ;;  %s1413_s5 = int_to_ptr.hbm [resolvable:$true] %s1412_s5 }
  0x6b   : > { %s1414_s15 = scalar_lea.hbm %s1413_s5, 32  ;;  %p1419_p1 = scmp.lt.s32.totalorder %s1413_s5, %s2087_s3 }
  0x6c   : > { %p1415_p12 = scmp.ne.s32.totalorder %s1413_s5, %s1414_s15  ;;  %p1420_p2 = scmp.lt.s32.totalorder %s1418_s8, %s1414_s15 }
  0x6e   : > { %p1416_p13 = pnand %p1415_p12, %p1546_p4  ;;  %p1421_p3 = por %p1420_p2, %p1419_p1 }
  0x70   : > { %p1417_p0 = pneg %p1416_p13 }
  0x71   : > { %426 = vperm.xlu1 %1342, %v1572_v1   ;;  %430 = vperm.xlu2 %1340, %v1587_v4  }
  0x72   : > { %422 = vperm.xlu0 %1341, %v1590_v5   ;;  %p1422_p5 = pnand %p1421_p3, %p1417_p0 }
  0x73   : > { %v246_v17 = vpop.permute.xlu2 %245 }
  0x74   : > { %v289_v53 = vadd.f32 %v246_v17, %v1569_v0 }
  0x79   : > { %434 = vperm.xlu1 %1342, %v1569_v0   ;;  %438 = vperm.xlu2 %1340, %v1584_v3  }
  0x7a   : > { %442 = vperm.xlu0 %1341, %v1605_v8  }
  0x7b   : > { %v248_v18 = vpop.permute.xlu2 %247 }
  0x7c   : > { %v290_v60 = vadd.f32 %v248_v18, %v1584_v3 }
  0x81   : > { %446 = vperm.xlu1 %1342, %v1602_v7   ;;  %450 = vperm.xlu2 %1340, %v1599_v6  }
  0x82   : > { %454 = vperm.xlu0 %1341, %v1620_v11  }
  0x83   : > { %v1674_v19 = vpop.permute.xlu2 %253 }
  0x89   : > { %458 = vperm.xlu1 %1342, %v1617_v10   ;;  %462 = vperm.xlu2 %1340, %v1614_v9  }
  0x8a   : > { %466 = vperm.xlu0 %1341, %v1635_v14  }
  0x8b   : > { %v1679_v20 = vpop.permute.xlu2 %259  ;;  %v242_v21 = vpop.permute.xlu1 %241 }
  0x8c   : > { %v238_v22 = vpop.permute.xlu0 %237  ;;  %v287_v46 = vadd.f32 %v242_v21, %v1572_v1 }
  0x8d   : > { %v285_v37 = vadd.f32 %v238_v22, %v1575_v2 }
  0x91   : > { %470 = vperm.xlu1 %1342, %v1632_v13   ;;  %474 = vperm.xlu2 %1340, %v1629_v12  }
  0x92   : > { %478 = vperm.xlu0 %1341, %v1644_v15  }
  0x93   : > { %v1684_v23 = vpop.permute.xlu2 %265  ;;  %v244_v24 = vpop.permute.xlu1 %243 }
  0x94   : > { %v240_v25 = vpop.permute.xlu0 %239  ;;  %v288_v45 = vadd.f32 %v244_v24, %v1587_v4 }
  0x95   : > { %v286_v34 = vadd.f32 %v240_v25, %v1590_v5 }
  0x9b   : > { %v252_v26 = vpop.permute.xlu1 %251  ;;  %v304_v28 = vpop.permute.xlu2 %303 }
  0x9c   : > { %v250_v27 = vpop.permute.xlu0 %249  ;;  %v350_v35 = vadd.f32 %v304_v28, %v286_v34  ;;  %v292_v52 = vadd.f32 %v252_v26, %v1602_v7  ;;  %v293_v28 = vadd.f32 %v1674_v19, %v1599_v6 }
  0x9d   : > { %v291_v59 = vadd.f32 %v250_v27, %v1605_v8 }
  0x9e   : > { %vm366_vm0 = vcmp.ne.f32.partialorder %v350_v35, 0.0 }
  0x9f   : > { %v1251_v42 = vsel %vm366_vm0, 1.0, %v1481_v41 }
  0xa3   : > { %v1686_v29 = vpop.permute.xlu1 %257  ;;  %v310_v31 = vpop.permute.xlu2 %309 }
  0xa4   : > { %v256_v30 = vpop.permute.xlu0 %255  ;;  %v353_v57 = vadd.f32 %v310_v31, %v289_v53 }
  0xa5   : > { %v294_v27 = vadd.f32 %v256_v30, %v1620_v11 }
  0xa6   : > { %vm369_vm5 = vcmp.ne.f32.partialorder %v353_v57, 0.0 }
  0xa7   : > { %v1254_v24 = vsel %vm369_vm5, 1.0, %v1481_v41 }
  0xab   : > { %v264_v32 = vpop.permute.xlu1 %263  ;;  %v316_v36 = vpop.permute.xlu2 %315 }
  0xac   : > { %v1688_v33 = vpop.permute.xlu0 %261  ;;  %v356_v55 = vadd.f32 %v316_v36, %v292_v52 }
  0xae   : > { %vm372_vm4 = vcmp.ne.f32.partialorder %v356_v55, 0.0  ;;  %v299_v55 = vadd.f32 %v1684_v23, %v1629_v12  ;;  %v1743_v23 = vld [vmem:[%s2084_s0] ss:$0 sm:$0xff] }
  0xaf   : > { %v1257_v21 = vsel %vm372_vm4, 1.0, %v1481_v41 }
  0xb3   : > { %v302_v38 = vpop.permute.xlu1 %301  ;;  %v322_v47 = vpop.permute.xlu2 %321 }
  0xb4   : > { %v349_v39 = vadd.f32 %v302_v38, %v285_v37  ;;  %v1692_v40 = vpop.permute.xlu0 %267  ;;  %v298_v38 = vadd.f32 %v264_v32, %v1632_v13 }
  0xb6   : > { %vm365_vm1 = vcmp.ne.f32.partialorder %v349_v39, 0.0  ;;  %v295_v39 = vadd.f32 %v1686_v29, %v1617_v10 }
  0xb7   : > { %v1250_v43 = vsel %vm365_vm1, 1.0, %v1481_v41 }
  0xb8   : > { %v1343_v44 = vpack.i.bf16 %v1251_v42, %v1250_v43  ;;  %v359_v19 = vadd.f32 %v322_v47, %v295_v39  ;;  %v1483_v39 = vmov 2  }
  0xba   : > { %1344 = vperm.xlu1 %1342, %v1343_v44   ;;  %vm375_vm11 = vcmp.ne.f32.partialorder %v359_v19, 0.0 }
  0xbb   : > { %v308_v48 = vpop.permute.xlu1 %307  ;;  %v328_v16 = vpop.permute.xlu2 %327 }
  0xbc   : > { %v352_v49 = vadd.f32 %v308_v48, %v288_v45  ;;  %v306_v50 = vpop.permute.xlu0 %305  ;;  %v362_v30 = vadd.f32 %v328_v16, %v298_v38  ;;  %v297_v45 = vadd.f32 %v1688_v33, %v1635_v14  ;;  %v1260_v33 = vsel %vm375_vm11, 1.0, %v1481_v41 }
  0xbd   : > { %v351_v51 = vadd.f32 %v306_v50, %v287_v46  ;;  %v296_v46 = vadd.f32 %v1679_v20, %v1614_v9  ;;  %v1482_v16 = vmov 1  }
  0xbe   : > { %vm368_vm2 = vcmp.ne.f32.partialorder %v352_v49, 0.0  ;;  %vm378_vm10 = vcmp.ne.f32.partialorder %v362_v30, 0.0 }
  0xbf   : > { %v1253_v54 = vsel %vm368_vm2, 1.0, %v1481_v41  ;;  %vm367_vm3 = vcmp.ne.f32.partialorder %v351_v51, 0.0  ;;  %v1263_v51 = vsel %vm378_vm10, 1.0, %v1481_v41 }
  0xc0   : > { %v1252_v56 = vsel %vm367_vm3, 1.0, %v1481_v41 }
  0xc1   : > { %v1348_v58 = vpack.i.bf16 %v1253_v54, %v1252_v56  ;;  %v300_v54 = vadd.f32 %v1692_v40, %v1644_v15 }
  0xc3   : > { %1349 = vperm.xlu2 %1340, %v1348_v58   ;;  %v314_v61 = vpop.permute.xlu1 %313  ;;  %v1711_v37 = vpop.permute.xlu2 %418 }
  0xc4   : > { %v355_v62 = vadd.f32 %v314_v61, %v291_v59  ;;  %v312_v63 = vpop.permute.xlu0 %311 }
  0xc5   : > { %v354_v17 = vadd.f32 %v312_v63, %v290_v60 }
  0xc6   : > { %vm371_vm6 = vcmp.ne.f32.partialorder %v355_v62, 0.0 }
  0xc7   : > { %v1256_v22 = vsel %vm371_vm6, 1.0, %v1481_v41  ;;  %vm370_vm7 = vcmp.ne.f32.partialorder %v354_v17, 0.0 }
  0xc8   : > { %v1358_v25 = vpack.i.bf16 %v1257_v21, %v1256_v22  ;;  %v1255_v26 = vsel %vm370_vm7, 1.0, %v1481_v41 }
  0xc9   : > { %v1353_v18 = vpack.i.bf16 %v1255_v26, %v1254_v24 }
  0xca   : > { %1359 = vperm.xlu1 %1342, %v1358_v25  }
  0xcb   : > { %1354 = vperm.xlu0 %1341, %v1353_v18   ;;  %v320_v31 = vpop.permute.xlu1 %319  ;;  %v1722_v50 = vpop.permute.xlu2 %430 }
  0xcc   : > { %v358_v34 = vadd.f32 %v320_v31, %v294_v27  ;;  %v318_v35 = vpop.permute.xlu0 %317 }
  0xcd   : > { %v357_v36 = vadd.f32 %v318_v35, %v293_v28 }
  0xce   : > { %vm374_vm8 = vcmp.ne.f32.partialorder %v358_v34, 0.0 }
  0xcf   : > { %v1259_v42 = vsel %vm374_vm8, 1.0, %v1481_v41  ;;  %vm373_vm9 = vcmp.ne.f32.partialorder %v357_v36, 0.0 }
  0xd0   : > { %v1258_v43 = vsel %vm373_vm9, 1.0, %v1481_v41 }
  0xd1   : > { %v1363_v44 = vpack.i.bf16 %v1259_v42, %v1258_v43 }
  0xd3   : > { %1364 = vperm.xlu2 %1340, %v1363_v44   ;;  %v326_v32 = vpop.permute.xlu1 %325  ;;  %v1732_v60 = vpop.permute.xlu2 %438 }
  0xd4   : > { %v361_v48 = vadd.f32 %v326_v32, %v297_v45  ;;  %v324_v49 = vpop.permute.xlu0 %323 }
  0xd5   : > { %v360_v29 = vadd.f32 %v324_v49, %v296_v46 }
  0xd6   : > { %vm377_vm12 = vcmp.ne.f32.partialorder %v361_v48, 0.0 }
  0xd7   : > { %v1262_v47 = vsel %vm377_vm12, 1.0, %v1481_v41  ;;  %vm376_vm13 = vcmp.ne.f32.partialorder %v360_v29, 0.0 }
  0xd8   : > { %v1373_v52 = vpack.i.bf16 %v1263_v51, %v1262_v47  ;;  %v1261_v20 = vsel %vm376_vm13, 1.0, %v1481_v41 }
  0xd9   : > { %v1368_v53 = vpack.i.bf16 %v1261_v20, %v1260_v33 }
  0xda   : > { %1374 = vperm.xlu1 %1342, %v1373_v52  }
  0xdb   : > { %1369 = vperm.xlu0 %1341, %v1368_v53   ;;  %v332_v56 = vpop.permute.xlu1 %331  ;;  %v451_v21 = vpop.permute.xlu2 %450 }
  0xdc   : > { %v364_v57 = vadd.f32 %v332_v56, %v300_v54  ;;  %v330_v58 = vpop.permute.xlu0 %329 }
  0xdd   : > { %v363_v59 = vadd.f32 %v330_v58, %v299_v55 }
  0xde   : > { %vm380_vm14 = vcmp.ne.f32.partialorder %v364_v57, 0.0  ;;  %v487_v57 = vsub.f32 %v1722_v50, %v1743_v23 }
  0xdf   : > { %v1265_v61 = vsel %vm380_vm14, 1.0, %v1481_v41  ;;  %vm379_vm15 = vcmp.ne.f32.partialorder %v363_v59, 0.0 }
  0xe0   : > { %v1264_v62 = vsel %vm379_vm15, 1.0, %v1481_v41  ;;  %v492_v41 = vsub.f32 %v451_v21, %v1743_v23 }
  0xe1   : > { %v1378_v63 = vpack.i.bf16 %v1265_v61, %v1264_v62 }
  0xe2   : > { %1384 = vset.pattern.permute.xlu1 %v1482_v16 }
  0xe3   : > { %1383 = vset.pattern.permute.xlu0 %v1482_v16  ;;  %1379 = vperm.xlu2 %1340, %v1378_v63   ;;  %v1736_v40 = vpop.permute.xlu1 %426  ;;  %v1755_v25 = vpop.permute.xlu2 %462  ;;  %v503_v63 = vand.u32 2147483647, %v487_v57 }
  0xe4   : > { %657 = vperm.xlu1 %1384, %v1590_v5   ;;  %653 = vperm.xlu0 %1383, %v1575_v2   ;;  %v1745_v17 = vpop.permute.xlu0 %422  ;;  %v495_v26 = vsub.f32 %v1755_v25, %v1743_v23 }
  0xeb   : > { %1385 = vset.pattern.permute.xlu2 %v1482_v16  ;;  %v1748_v22 = vpop.permute.xlu1 %434  ;;  %v475_v31 = vpop.permute.xlu2 %474 }
  0xec   : > { %665 = vperm.xlu1 %1384, %v1587_v4   ;;  %709 = vperm.xlu0 %1383, %v1629_v12   ;;  %v1752_v24 = vpop.permute.xlu0 %442  ;;  %v498_v34 = vsub.f32 %v475_v31, %v1743_v23 }
  0xed   : > { %661 = vperm.xlu2 %1385, %v1572_v1  }
  0xee   : > { %v514_v53 = vand.u32 2147483647, %v498_v34 }
  0xf0   : > { %v530_v61 = vsub.f32 1.0, %v514_v53 }
  0xf2   : > { %v546_v21 = vmax.f32 %v530_v61, 0.0 }
  0xf3   : > { %v1759_v18 = vpop.permute.xlu1 %446 }
  0xf4   : > { %713 = vperm.xlu1 %1384, %v1644_v15   ;;  %693 = vperm.xlu0 %1383, %v1617_v10   ;;  %v455_v27 = vpop.permute.xlu0 %454 }
  0xf5   : > { %669 = vperm.xlu2 %1385, %v1569_v0   ;;  %v493_v28 = vsub.f32 %v455_v27, %v1743_v23 }
  0xfb   : > { %v1766_v35 = vpop.permute.xlu1 %458 }
  0xfc   : > { %701 = vperm.xlu1 %1384, %v1635_v14   ;;  %689 = vperm.xlu0 %1383, %v1620_v11   ;;  %v494_v36 = vsub.f32 %v1766_v35, %v1743_v23  ;;  %v1772_v38 = vpop.permute.xlu0 %466  ;;  %v489_v35 = vsub.f32 %v1732_v60, %v1743_v23 }
  0xfd   : > { %1386 = vset.pattern.permute.xlu2 %v1483_v39  ;;  %v496_v42 = vsub.f32 %v1772_v38, %v1743_v23  ;;  %v511_v38 = vand.u32 2147483647, %v495_v26 }
  0xfe   : > { %906 = vperm.xlu2 %1386, %v1629_v12  }
 0x103   : > { %v1777_v30 = vpop.permute.xlu1 %470 }
 0x104   : > { %1388 = vset.pattern.permute.xlu1 %v1483_v39  ;;  %677 = vperm.xlu0 %1383, %v1605_v8   ;;  %v497_v43 = vsub.f32 %v1777_v30, %v1743_v23  ;;  %v479_v19 = vpop.permute.xlu0 %478 }
 0x105   : > { %898 = vperm.xlu1 %1388, %v1635_v14   ;;  %v499_v44 = vsub.f32 %v479_v19, %v1743_v23  ;;  %v508_v14 = vand.u32 2147483647, %v492_v41 }
 0x106   : > { %1387 = vset.pattern.permute.xlu2 %v1482_v16 }
 0x107   : > { %705 = vperm.xlu2 %1387, %v1632_v13   ;;  %v515_v54 = vand.u32 2147483647, %v499_v44 }
 0x109   : > { %v531_v62 = vsub.f32 1.0, %v515_v54 }
 0x10b   : > { %v547_v41 = vmax.f32 %v531_v62, 0.0 }
 0x10c   : > { %1394 = vset.pattern.permute.xlu0 %v1483_v39 }
 0x10d   : > { %1390 = vset.pattern.permute.xlu1 %v1482_v16  ;;  %910 = vperm.xlu0 %1394, %v1644_v15   ;;  %v509_v15 = vand.u32 2147483647, %v493_v28 }
 0x10e   : > { %697 = vperm.xlu1 %1390, %v1614_v9  }
 0x10f   : > { %1389 = vset.pattern.permute.xlu2 %v1483_v39  ;;  %v525_v45 = vsub.f32 1.0, %v509_v15 }
 0x110   : > { %902 = vperm.xlu2 %1389, %v1632_v13   ;;  %v524_v13 = vsub.f32 1.0, %v508_v14  ;;  %v513_v14 = vand.u32 2147483647, %v497_v43 }
 0x111   : > { %v541_v46 = vmax.f32 %v525_v45, 0.0 }
 0x115   : > { %878 = vperm.xlu0 %1394, %v1602_v7  }
 0x116   : > { %1391 = vset.pattern.permute.xlu1 %v1483_v39 }
 0x117   : > { %894 = vperm.xlu1 %1391, %v1614_v9   ;;  %v485_v9 = vsub.f32 %v1745_v17, %v1743_v23 }
 0x118   : > { %890 = vperm.xlu2 %1389, %v1617_v10  }
 0x119   : > { %v501_v29 = vand.u32 2147483647, %v485_v9  ;;  %v529_v9 = vsub.f32 1.0, %v513_v14  ;;  %v414_v14 = vld [vmem:[%s2085_s1] ss:$2 sm:$0x3] }
 0x11b   : > { %v517_v33 = vsub.f32 1.0, %v501_v29  ;;  %v545_v26 = vmax.f32 %v529_v9, 0.0 }
 0x11d   : > { %862 = vperm.xlu0 %1394, %v1587_v4   ;;  %v1794_v12 = vpop.permute.xlu2 %1349  ;;  %v484_v4 = vsub.f32 %v1711_v37, %v1743_v23  ;;  %v533_v56 = vmax.f32 %v517_v33, 0.0 }
 0x11e   : > { %v1352_v15 = vunpack.i.h.bf16 %v1794_v12 }
 0x11f   : > { %882 = vperm.xlu1 %1391, %v1599_v6   ;;  %v500_v49 = vand.u32 2147483647, %v484_v4 }
 0x120   : > { %1392 = vset.pattern.permute.xlu2 %v1482_v16 }
 0x121   : > { %685 = vperm.xlu2 %1392, %v1599_v6   ;;  %v540_v6 = vmax.f32 %v524_v13, 0.0  ;;  %v516_v47 = vsub.f32 1.0, %v500_v49 }
 0x123   : > { %v532_v55 = vmax.f32 %v516_v47, 0.0 }
 0x127   : > { %1395 = vset.pattern.permute.xlu1 %v1482_v16 }
 0x128   : > { %681 = vperm.xlu1 %1395, %v1602_v7  }
 0x129   : > { %1393 = vset.pattern.permute.xlu2 %v1483_v39 }
 0x12a   : > { %886 = vperm.xlu2 %1393, %v1620_v11  }
 0x12c   : > { %v1345_v11 = vpop.permute.xlu1 %1344 }
 0x12d   : > { %v1365_v10 = vpop.permute.xlu2 %1364  ;;  %v1347_v52 = vunpack.i.h.bf16 %v1345_v11  ;;  %v1346_v20 = vunpack.i.l.bf16 %v1345_v11 }
 0x12e   : > { %v1367_v32 = vunpack.i.h.bf16 %v1365_v10  ;;  %v1366_v48 = vunpack.i.l.bf16 %v1365_v10 }
 0x12f   : > { %v628_v58 = vmul.f32 %v1346_v20, %v532_v55  ;;  %v629_v59 = vmul.f32 %v1347_v52, %v533_v56  ;;  %v505_v20 = vand.u32 2147483647, %v489_v35 }
 0x130   : > { %v1802_v51 = vmul.f32 %v1366_v48, %v540_v6  ;;  %v1804_v7 = vmul.f32 %v1367_v32, %v541_v46  ;;  %673 = vperm.xlu1 %1395, %v1584_v3   ;;  %v527_v6 = vsub.f32 1.0, %v511_v38 }
 0x131   : > { %v644_v17 = vpack.c.bf16 %v629_v59, %v628_v58  ;;  %v521_v58 = vsub.f32 1.0, %v505_v20 }
 0x132   : > { %v648_v37 = vpack.c.bf16 %v1804_v7, %v1802_v51  ;;  %874 = vperm.xlu2 %1393, %v1605_v8   ;;  %v486_v8 = vsub.f32 %v1736_v40, %v1743_v23  ;;  %v543_v11 = vmax.f32 %v527_v6, 0.0 }
 0x134   : > { %v502_v31 = vand.u32 2147483647, %v486_v8 }
 0x136   : > { %v518_v40 = vsub.f32 1.0, %v502_v31 }
 0x138   : > { %1396 = vset.pattern.permute.xlu1 %v1483_v39  ;;  %v512_v39 = vand.u32 2147483647, %v496_v42  ;;  %v534_v42 = vmax.f32 %v518_v40, 0.0 }
 0x139   : > { %870 = vperm.xlu1 %1396, %v1584_v3   ;;  %v519_v3 = vsub.f32 1.0, %v503_v63 }
 0x13a   : > { %866 = vperm.xlu2 %1393, %v1569_v0   ;;  %v528_v4 = vsub.f32 1.0, %v512_v39 }
 0x13b   : > { %v535_v44 = vmax.f32 %v519_v3, 0.0 }
 0x13c   : > { %v1827_v19 = vpop.permute.xlu1 %1359 }
 0x13d   : > { %v1380_v16 = vpop.permute.xlu2 %1379  ;;  %v1355_v13 = vpop.permute.xlu0 %1354  ;;  %v631_v30 = vmul.f32 %v1352_v15, %v535_v44  ;;  %v1361_v38 = vunpack.i.l.bf16 %v1827_v19 }
 0x13e   : > { %v1382_v27 = vunpack.i.h.bf16 %v1380_v16  ;;  %v1381_v28 = vunpack.i.l.bf16 %v1380_v16  ;;  %v1357_v59 = vunpack.i.h.bf16 %v1355_v13  ;;  %v1356_v61 = vunpack.i.l.bf16 %v1355_v13  ;;  %v1266_v13 = vld [vmem:[%s2085_s1 + $0x1] ss:$2 sm:$0x3] }
 0x13f   : > { %1094 = vxpose.xlu0.c.b16.start [1/8] (narrow) %v644_v17, 16  ;;  %v537_v16 = vmax.f32 %v521_v58, 0.0  ;;  %v1885_v9 = vperm.slane %v1266_v13, 0 }
 0x140   : > { %v1816_v50 = vmul.f32 %v1381_v28, %v546_v21  ;;  %v1818_v34 = vmul.f32 %v1382_v27, %v547_v41  ;;  %v491_v27 = vsub.f32 %v1759_v18, %v1743_v23  ;;  %v490_v28 = vsub.f32 %v1752_v24, %v1743_v23 }
 0x141   : > { %850 = vperm.xlu1 %1396, %v1575_v2   ;;  %v1351_v2 = vunpack.i.l.bf16 %v1794_v12  ;;  %v488_v12 = vsub.f32 %v1748_v22, %v1743_v23  ;;  %v633_v21 = vmul.f32 %v1357_v59, %v537_v16  ;;  %v1877_v23 = vperm.slane %v414_v14, 1 }
 0x142   : > { %858 = vperm.xlu2 %1393, %v1572_v1   ;;  %v510_v1 = vand.u32 2147483647, %v494_v36  ;;  %v544_v36 = vmax.f32 %v528_v4, 0.0  ;;  %v507_v3 = vand.u32 2147483647, %v491_v27  ;;  %v1362_v24 = vunpack.i.h.bf16 %v1827_v19 }
 0x143   : > { %v630_v43 = vmul.f32 %v1351_v2, %v534_v42  ;;  %v504_v52 = vand.u32 2147483647, %v488_v12  ;;  %v506_v44 = vand.u32 2147483647, %v490_v28 }
 0x144   : > { %v526_v10 = vsub.f32 1.0, %v510_v1  ;;  %v523_v2 = vsub.f32 1.0, %v507_v3  ;;  %v1875_v1 = vperm.slane %v414_v14, 0 }
 0x145   : > { %v645_v46 = vpack.c.bf16 %v631_v30, %v630_v43  ;;  %v520_v57 = vsub.f32 1.0, %v504_v52  ;;  %v522_v18 = vsub.f32 1.0, %v506_v44  ;;  %v1887_v43 = vperm.slane %v1266_v13, 1 }
 0x146   : > { %v542_v29 = vmax.f32 %v526_v10, 0.0  ;;  %v539_v30 = vmax.f32 %v523_v2, 0.0 }
 0x147   : > { %v1840_v45 = vpop.permute.xlu2 %661  ;;  %v536_v63 = vmax.f32 %v520_v57, 0.0  ;;  %v538_v12 = vmax.f32 %v522_v18, 0.0 }
 0x148   : > { %v725_v42 = vsub.f32 %v1840_v45, %v1875_v1  ;;  %v726_v4 = vsub.f32 %v1840_v45, %v1877_v23  ;;  %v635_v35 = vmul.f32 %v1362_v24, %v539_v30 }
 0x149   : > { %v632_v41 = vmul.f32 %v1356_v61, %v536_v63 }
 0x14a   : > { %854 = vperm.xlu2 %1393, %v1590_v5  }
 0x14b   : > { %v646_v31 = vpack.c.bf16 %v633_v21, %v632_v41 }
 0x14c   : > { %v1375_v25 = vpop.permute.xlu1 %1374 }
 0x14d   : > { %v1377_v32 = vunpack.i.h.bf16 %v1375_v25  ;;  %v1376_v48 = vunpack.i.l.bf16 %v1375_v25  ;;  %v1370_v49 = vpop.permute.xlu0 %1369  ;;  %v757_v25 = vand.u32 2147483647, %v725_v42 }
 0x14e   : > { %v1372_v47 = vunpack.i.h.bf16 %v1370_v49  ;;  %v1371_v33 = vunpack.i.l.bf16 %v1370_v49 }
 0x14f   : > { %v1847_v5 = vmul.f32 %v1377_v32, %v545_v26  ;;  %v1849_v53 = vmul.f32 %v1376_v48, %v544_v36  ;;  %1095 = vxpose.xlu0.c.b16.cont [2/8] (narrow) %v645_v46, 16  ;;  %v1851_v22 = vpop.permute.xlu2 %669  ;;  %v634_v36 = vmul.f32 %v1361_v38, %v538_v12  ;;  %v758_v26 = vand.u32 2147483647, %v726_v4 }
 0x150   : > { %v1853_v60 = vmul.f32 %v1372_v47, %v543_v11  ;;  %v1855_v54 = vmul.f32 %v1371_v33, %v542_v29  ;;  %v789_v11 = vsub.f32 1.0, %v757_v25  ;;  %v729_v28 = vsub.f32 %v1851_v22, %v1875_v1 }
 0x151   : > { %v647_v29 = vpack.c.bf16 %v635_v35, %v634_v36  ;;  %v790_v47 = vsub.f32 1.0, %v758_v26 }
 0x152   : > { %v649_v56 = vpack.c.bf16 %v1853_v60, %v1855_v54  ;;  %v1900_v41 = vmax.f32 %v789_v11, 0.0  ;;  %v1913_v30 = vand.u32 2147483647, %v729_v28 }
 0x153   : > { %v1902_v27 = vmax.f32 %v790_v47, 0.0 }
 0x156   : > { %v1861_v62 = vpop.permute.xlu0 %653  ;;  %v1863_v8 = vpop.permute.xlu1 %657 }
 0x158   : > { %v907_v17 = vpop.permute.xlu2 %906 }
 0x159   : > { %v946_v19 = vsub.f32 %v907_v17, %v1885_v9  ;;  %v947_v46 = vsub.f32 %v907_v17, %v1887_v43 }
 0x15b   : > { %v978_v33 = vand.u32 2147483647, %v946_v19  ;;  %v979_v52 = vand.u32 2147483647, %v947_v46 }
 0x15d   : > { %v1011_v3 = vsub.f32 1.0, %v979_v52 }
 0x15e   : > { %v710_v40 = vpop.permute.xlu0 %709  ;;  %v666_v39 = vpop.permute.xlu1 %665 }
 0x15f   : > { %1096 = vxpose.xlu0.c.b16.cont [3/8] (narrow) %v646_v31, 16  ;;  %v749_v32 = vsub.f32 %v710_v40, %v1875_v1  ;;  %v750_v45 = vsub.f32 %v710_v40, %v1877_v23  ;;  %v727_v49 = vsub.f32 %v666_v39, %v1875_v1  ;;  %v728_v57 = vsub.f32 %v666_v39, %v1877_v23 }
 0x160   : > { %v1010_v31 = vsub.f32 1.0, %v978_v33  ;;  %v1043_v36 = vmax.f32 %v1011_v3, 0.0 }
 0x161   : > { %v706_v15 = vpop.permute.xlu2 %705  ;;  %v781_v20 = vand.u32 2147483647, %v749_v32  ;;  %v782_v61 = vand.u32 2147483647, %v750_v45  ;;  %v759_v63 = vand.u32 2147483647, %v727_v49 }
 0x162   : > { %v747_v16 = vsub.f32 %v706_v15, %v1875_v1  ;;  %v748_v17 = vsub.f32 %v706_v15, %v1877_v23  ;;  %v760_v40 = vand.u32 2147483647, %v728_v57  ;;  %v1042_v35 = vmax.f32 %v1010_v31, 0.0 }
 0x163   : > { %v813_v14 = vsub.f32 1.0, %v781_v20  ;;  %v814_v2 = vsub.f32 1.0, %v782_v61  ;;  %v791_v13 = vsub.f32 1.0, %v759_v63 }
 0x164   : > { %v779_v24 = vand.u32 2147483647, %v747_v16  ;;  %v780_v38 = vand.u32 2147483647, %v748_v17  ;;  %v792_v32 = vsub.f32 1.0, %v760_v40 }
 0x165   : > { %v846_v46 = vmax.f32 %v814_v2, 0.0 }
 0x166   : > { %v694_v10 = vpop.permute.xlu0 %693  ;;  %v714_v6 = vpop.permute.xlu1 %713  ;;  %v811_v11 = vsub.f32 1.0, %v779_v24  ;;  %v812_v47 = vsub.f32 1.0, %v780_v38 }
 0x167   : > { %v741_v21 = vsub.f32 %v694_v10, %v1875_v1  ;;  %v742_v39 = vsub.f32 %v694_v10, %v1877_v23  ;;  %v751_v44 = vsub.f32 %v714_v6, %v1875_v1  ;;  %v752_v15 = vsub.f32 %v714_v6, %v1877_v23 }
 0x168   : > { %v845_v6 = vmax.f32 %v813_v14, 0.0 }
 0x169   : > { %v773_v42 = vand.u32 2147483647, %v741_v21  ;;  %v774_v25 = vand.u32 2147483647, %v742_v39  ;;  %v783_v26 = vand.u32 2147483647, %v751_v44 }
 0x16a   : > { %v903_v48 = vpop.permute.xlu2 %902  ;;  %v784_v45 = vand.u32 2147483647, %v752_v15  ;;  %v1925_v21 = vmax.f32 %v792_v32, 0.0  ;;  %v843_v39 = vmax.f32 %v811_v11, 0.0  ;;  %v844_v44 = vmax.f32 %v812_v47, 0.0 }
 0x16b   : > { %v944_v12 = vsub.f32 %v903_v48, %v1885_v9  ;;  %v945_v10 = vsub.f32 %v903_v48, %v1887_v43  ;;  %v805_v33 = vsub.f32 1.0, %v773_v42  ;;  %v806_v61 = vsub.f32 1.0, %v774_v25 }
 0x16c   : > { %v815_v63 = vsub.f32 1.0, %v783_v26  ;;  %v816_v28 = vsub.f32 1.0, %v784_v45 }
 0x16d   : > { %v976_v52 = vand.u32 2147483647, %v944_v12  ;;  %v977_v20 = vand.u32 2147483647, %v945_v10  ;;  %v1931_v14 = vmax.f32 %v805_v33, 0.0  ;;  %v1935_v38 = vmax.f32 %v806_v61, 0.0 }
 0x16e   : > { %v1895_v58 = vpop.permute.xlu0 %689  ;;  %v702_v59 = vpop.permute.xlu1 %701  ;;  %v847_v42 = vmax.f32 %v815_v63, 0.0  ;;  %v848_v25 = vmax.f32 %v816_v28, 0.0 }
 0x16f   : > { %1097 = vxpose.xlu0.c.b16.cont [4/8] (narrow) %v647_v29, 16  ;;  %v1919_v29 = vmax.f32 %v791_v13, 0.0  ;;  %v745_v48 = vsub.f32 %v702_v59, %v1875_v1  ;;  %v746_v57 = vsub.f32 %v702_v59, %v1877_v23  ;;  %v739_v31 = vsub.f32 %v1895_v58, %v1875_v1 }
 0x170   : > { %v740_v3 = vsub.f32 %v1895_v58, %v1877_v23  ;;  %v1933_v59 = vmul.f32 %v1042_v35, %v845_v6  ;;  %v1008_v2 = vsub.f32 1.0, %v976_v52  ;;  %v1009_v13 = vsub.f32 1.0, %v977_v20 }
 0x171   : > { %v777_v15 = vand.u32 2147483647, %v745_v48  ;;  %v778_v24 = vand.u32 2147483647, %v746_v57  ;;  %v1937_v26 = vand.u32 2147483647, %v739_v31  ;;  %v1944_v35 = vmul.f32 %v1043_v36, %v846_v46 }
 0x172   : > { %v1909_v18 = vpop.permute.xlu2 %890  ;;  %v1939_v58 = vand.u32 2147483647, %v740_v3  ;;  %v1040_v33 = vmax.f32 %v1008_v2, 0.0  ;;  %v1041_v52 = vmax.f32 %v1009_v13, 0.0 }
 0x173   : > { %v938_v6 = vsub.f32 %v1909_v18, %v1885_v9  ;;  %v939_v45 = vsub.f32 %v1909_v18, %v1887_v43  ;;  %v809_v20 = vsub.f32 1.0, %v777_v15  ;;  %v810_v48 = vsub.f32 1.0, %v778_v24 }
 0x174   : > { %v803_v36 = vsub.f32 1.0, %v1937_v26  ;;  %v804_v46 = vsub.f32 1.0, %v1939_v58 }
 0x175   : > { %v970_v63 = vand.u32 2147483647, %v938_v6  ;;  %v841_v3 = vmax.f32 %v809_v20, 0.0  ;;  %v842_v2 = vmax.f32 %v810_v48, 0.0  ;;  %v1073_v6 = vmul.f32 %v1041_v52, %v844_v44 }
 0x176   : > { %v1917_v19 = vpop.permute.xlu0 %677 }
 0x177   : > { %v899_v49 = vpop.permute.xlu1 %898 }
 0x178   : > { %v942_v16 = vsub.f32 %v899_v49, %v1885_v9  ;;  %v943_v17 = vsub.f32 %v899_v49, %v1887_v43 }
 0x17a   : > { %v974_v12 = vand.u32 2147483647, %v942_v16  ;;  %v975_v10 = vand.u32 2147483647, %v943_v17  ;;  %v971_v16 = vand.u32 2147483647, %v939_v45 }
 0x17b   : > { %v686_v40 = vpop.permute.xlu2 %685  ;;  %v1002_v45 = vsub.f32 1.0, %v970_v63 }
 0x17c   : > { %v1006_v57 = vsub.f32 1.0, %v974_v12  ;;  %v1007_v51 = vsub.f32 1.0, %v975_v10  ;;  %v737_v13 = vsub.f32 %v686_v40, %v1875_v1  ;;  %v738_v15 = vsub.f32 %v686_v40, %v1877_v23 }
 0x17e   : > { %v1038_v24 = vmax.f32 %v1006_v57, 0.0  ;;  %v1039_v12 = vmax.f32 %v1007_v51, 0.0  ;;  %v769_v20 = vand.u32 2147483647, %v737_v13  ;;  %v770_v48 = vand.u32 2147483647, %v738_v15 }
 0x17f   : > { %v911_v32 = vpop.permute.xlu0 %910  ;;  %1098 = vxpose.xlu0.c.b16.cont [5/8] (narrow) %v648_v37, 16 }
 0x180   : > { %v948_v49 = vsub.f32 %v911_v32, %v1885_v9  ;;  %v949_v11 = vsub.f32 %v911_v32, %v1887_v43  ;;  %v698_v47 = vpop.permute.xlu1 %697  ;;  %v801_v13 = vsub.f32 1.0, %v769_v20 }
 0x181   : > { %v743_v61 = vsub.f32 %v698_v47, %v1875_v1  ;;  %v744_v18 = vsub.f32 %v698_v47, %v1877_v23  ;;  %v1072_v47 = vmul.f32 %v1040_v33, %v843_v39 }
 0x182   : > { %v980_v7 = vand.u32 2147483647, %v948_v49  ;;  %v981_v37 = vand.u32 2147483647, %v949_v11 }
 0x183   : > { %v775_v49 = vand.u32 2147483647, %v743_v61  ;;  %v776_v11 = vand.u32 2147483647, %v744_v18  ;;  %v1070_v18 = vmul.f32 %v1038_v24, %v841_v3  ;;  %v733_v3 = vsub.f32 %v1917_v19, %v1875_v1 }
 0x184   : > { %v1012_v17 = vsub.f32 1.0, %v980_v7  ;;  %v1013_v28 = vsub.f32 1.0, %v981_v37  ;;  %v887_v31 = vpop.permute.xlu2 %886  ;;  %v1003_v7 = vsub.f32 1.0, %v971_v16 }
 0x185   : > { %v936_v55 = vsub.f32 %v887_v31, %v1885_v9  ;;  %v937_v40 = vsub.f32 %v887_v31, %v1887_v43  ;;  %v808_v39 = vsub.f32 1.0, %v776_v11  ;;  %v802_v31 = vsub.f32 1.0, %v770_v48 }
 0x186   : > { %v1044_v10 = vmax.f32 %v1012_v17, 0.0  ;;  %v1045_v32 = vmax.f32 %v1013_v28, 0.0  ;;  %v1071_v17 = vmul.f32 %v1039_v12, %v842_v2  ;;  %v807_v28 = vsub.f32 1.0, %v775_v49 }
 0x187   : > { %v1958_v0 = vpop.permute.xlu0 %878  ;;  %v1035_v33 = vmax.f32 %v1003_v7, 0.0  ;;  %v968_v15 = vand.u32 2147483647, %v936_v55  ;;  %v734_v2 = vsub.f32 %v1917_v19, %v1877_v23  ;;  %v1090_v12 = vpack.c.bf16 %v1072_v47, %v1070_v18 }
 0x188   : > { %v1076_v37 = vmul.f32 %v1044_v10, %v847_v42  ;;  %v1077_v4 = vmul.f32 %v1045_v32, %v848_v25  ;;  %v1034_v25 = vmax.f32 %v1002_v45, 0.0  ;;  %v969_v10 = vand.u32 2147483647, %v937_v40 }
 0x189   : > { %v895_v57 = vpop.permute.xlu1 %894  ;;  %v1091_v32 = vpack.c.bf16 %v1073_v6, %v1071_v17  ;;  %v1067_v45 = vmul.f32 %v1035_v33, %v1935_v38  ;;  %v833_v7 = vmax.f32 %v801_v13, 0.0  ;;  %v1000_v20 = vsub.f32 1.0, %v968_v15 }
 0x18a   : > { %v940_v51 = vsub.f32 %v895_v57, %v1885_v9  ;;  %v941_v61 = vsub.f32 %v895_v57, %v1887_v43  ;;  %v1092_v44 = vpack.c.bf16 %v1076_v37, %v1933_v59  ;;  %v1093_v42 = vpack.c.bf16 %v1077_v4, %v1944_v35 }
 0x18b   : > { %v839_v4 = vmax.f32 %v807_v28, 0.0  ;;  %v840_v35 = vmax.f32 %v808_v39, 0.0  ;;  %v1066_v11 = vmul.f32 %v1034_v25, %v1931_v14  ;;  %v834_v37 = vmax.f32 %v802_v31, 0.0 }
 0x18c   : > { %v972_v52 = vand.u32 2147483647, %v940_v51  ;;  %v973_v63 = vand.u32 2147483647, %v941_v61  ;;  %v875_v16 = vpop.permute.xlu2 %874  ;;  %1110 = vmatpush.bf16.msra.mxu0 %v1092_v44  ;;  %1124 = vmatpush.bf16.msra.mxu1 %v1093_v42  ;;  %v1001_v19 = vsub.f32 1.0, %v969_v10  ;;  %v932_v14 = vsub.f32 %v1958_v0, %v1885_v9 }
 0x18d   : > { %v930_v57 = vsub.f32 %v875_v16, %v1885_v9  ;;  %v931_v60 = vsub.f32 %v875_v16, %v1887_v43  ;;  %v933_v38 = vsub.f32 %v1958_v0, %v1887_v43  ;;  %v1032_v39 = vmax.f32 %v1000_v20, 0.0 }
 0x18e   : > { %v1004_v59 = vsub.f32 1.0, %v972_v52  ;;  %v1005_v24 = vsub.f32 1.0, %v973_v63  ;;  %v1033_v44 = vmax.f32 %v1001_v19, 0.0  ;;  %v835_v0 = vmax.f32 %v803_v36, 0.0 }
 0x18f   : > { %1099 = vxpose.xlu0.c.b16.cont [6/8] (narrow) %v649_v56, 16  ;;  %v863_v48 = vpop.permute.xlu0 %862  ;;  %v962_v33 = vand.u32 2147483647, %v930_v57  ;;  %v963_v52 = vand.u32 2147483647, %v931_v60  ;;  %v836_v13 = vmax.f32 %v804_v46, 0.0 }
 0x190   : > { %v1036_v55 = vmax.f32 %v1004_v59, 0.0  ;;  %v1037_v49 = vmax.f32 %v1005_v24, 0.0  ;;  %1111 = vmatpush.bf16.msra.mxu0 %v1090_v12  ;;  %1125 = vmatpush.bf16.msra.mxu1 %v1091_v32  ;;  %v924_v51 = vsub.f32 %v863_v48, %v1885_v9  ;;  %v925_v61 = vsub.f32 %v863_v48, %v1887_v43 }
 0x191   : > { %v883_v40 = vpop.permute.xlu1 %882  ;;  %v765_v31 = vand.u32 2147483647, %v733_v3  ;;  %v766_v15 = vand.u32 2147483647, %v734_v2  ;;  %v965_v12 = vand.u32 2147483647, %v933_v38  ;;  %v1064_v32 = vmul.f32 %v1032_v39, %v835_v0 }
 0x192   : > { %v934_v54 = vsub.f32 %v883_v40, %v1885_v9  ;;  %v935_v56 = vsub.f32 %v883_v40, %v1887_v43  ;;  %v1068_v47 = vmul.f32 %v1036_v55, %v839_v4  ;;  %v1069_v6 = vmul.f32 %v1037_v49, %v840_v35 }
 0x193   : > { %v956_v10 = vand.u32 2147483647, %v924_v51  ;;  %v957_v59 = vand.u32 2147483647, %v925_v61  ;;  %v964_v35 = vand.u32 2147483647, %v932_v14  ;;  %v1065_v55 = vmul.f32 %v1033_v44, %v836_v13 }
 0x194   : > { %v966_v18 = vand.u32 2147483647, %v934_v54  ;;  %v967_v17 = vand.u32 2147483647, %v935_v56  ;;  %v1985_v28 = vpop.permute.xlu2 %866  ;;  %v1088_v42 = vpack.c.bf16 %v1068_v47, %v1066_v11  ;;  %v1089_v25 = vpack.c.bf16 %v1069_v6, %v1067_v45 }
 0x195   : > { %v994_v49 = vsub.f32 1.0, %v962_v33  ;;  %v995_v11 = vsub.f32 1.0, %v963_v52  ;;  %v797_v20 = vsub.f32 1.0, %v765_v31  ;;  %v798_v58 = vsub.f32 1.0, %v766_v15 }
 0x196   : > { %v998_v63 = vsub.f32 1.0, %v966_v18  ;;  %v999_v16 = vsub.f32 1.0, %v967_v17  ;;  %1112 = vmatpush.bf16.msra.mxu0 %v1088_v42  ;;  %1126 = vmatpush.bf16.msra.mxu1 %v1089_v25  ;;  %v988_v2 = vsub.f32 1.0, %v956_v10  ;;  %v989_v19 = vsub.f32 1.0, %v957_v59 }
 0x197   : > { %v996_v38 = vsub.f32 1.0, %v964_v35  ;;  %v1027_v47 = vmax.f32 %v995_v11, 0.0  ;;  %v829_v17 = vmax.f32 %v797_v20, 0.0  ;;  %v830_v39 = vmax.f32 %v798_v58, 0.0 }
 0x198   : > { %v1030_v24 = vmax.f32 %v998_v63, 0.0  ;;  %v1031_v4 = vmax.f32 %v999_v16, 0.0  ;;  %v1020_v44 = vmax.f32 %v988_v2, 0.0  ;;  %v1021_v42 = vmax.f32 %v989_v19, 0.0 }
 0x199   : > { %v2090_v25 = vpack.c.bf16 %v1847_v5, %v1849_v53  ;;  %v1028_v0 = vmax.f32 %v996_v38, 0.0  ;;  %v926_v31 = vsub.f32 %v1985_v28, %v1885_v9  ;;  %v927_v15 = vsub.f32 %v1985_v28, %v1887_v43 }
 0x19a   : > { %v682_v45 = vpop.permute.xlu1 %681  ;;  %v1062_v26 = vmul.f32 %v1030_v24, %v833_v7  ;;  %v1063_v36 = vmul.f32 %v1031_v4, %v834_v37  ;;  %v997_v7 = vsub.f32 1.0, %v965_v12  ;;  %v1026_v37 = vmax.f32 %v994_v49, 0.0 }
 0x19b   : > { %v735_v46 = vsub.f32 %v682_v45, %v1875_v1  ;;  %v736_v3 = vsub.f32 %v682_v45, %v1877_v23  ;;  %v1059_v35 = vmul.f32 %v1027_v47, %v830_v39  ;;  %v793_v11 = vsub.f32 1.0, %v1913_v30 }
 0x19c   : > { %v859_v48 = vpop.permute.xlu2 %858  ;;  %v1086_v40 = vpack.c.bf16 %v1064_v32, %v1062_v26  ;;  %v1087_v57 = vpack.c.bf16 %v1065_v55, %v1063_v36  ;;  %v1029_v13 = vmax.f32 %v997_v7, 0.0  ;;  %v1058_v4 = vmul.f32 %v1026_v37, %v829_v17 }
 0x19d   : > { %v767_v60 = vand.u32 2147483647, %v735_v46  ;;  %v768_v54 = vand.u32 2147483647, %v736_v3  ;;  %v922_v56 = vsub.f32 %v859_v48, %v1885_v9  ;;  %v923_v14 = vsub.f32 %v859_v48, %v1887_v43 }
 0x19e   : > { %1113 = vmatpush.bf16.msra.mxu0 %v1086_v40  ;;  %1127 = vmatpush.bf16.msra.mxu1 %v1087_v57  ;;  %v2091_v55 = vsub.f32 %v1851_v22, %v1877_v23  ;;  %v2009_v45 = vmul.f32 %v1020_v44, %v1919_v29  ;;  %v2012_v28 = vmul.f32 %v1021_v42, %v1925_v21  ;;  %v958_v46 = vand.u32 2147483647, %v926_v31 }
 0x19f   : > { %v799_v6 = vsub.f32 1.0, %v767_v60  ;;  %v800_v51 = vsub.f32 1.0, %v768_v54  ;;  %v954_v61 = vand.u32 2147483647, %v922_v56  ;;  %v955_v18 = vand.u32 2147483647, %v923_v14 }
 0x1a0   : > { %1100 = vxpose.xlu0.c.b16.cont [7/8] (narrow) %v2090_v25, 16  ;;  %v762_v49 = vand.u32 2147483647, %v2091_v55  ;;  %v959_v3 = vand.u32 2147483647, %v927_v15  ;;  %v825_v48 = vmax.f32 %v793_v11, 0.0  ;;  %v722_v47 = vsub.f32 %v1861_v62, %v1877_v23 }
 0x1a1   : > { %v831_v33 = vmax.f32 %v799_v6, 0.0  ;;  %v832_v52 = vmax.f32 %v800_v51, 0.0  ;;  %v986_v63 = vsub.f32 1.0, %v954_v61  ;;  %v987_v16 = vsub.f32 1.0, %v955_v18 }
 0x1a2   : > { %v674_v10 = vpop.permute.xlu1 %673  ;;  %v794_v21 = vsub.f32 1.0, %v762_v49  ;;  %v991_v40 = vsub.f32 1.0, %v959_v3  ;;  %v723_v6 = vsub.f32 %v1863_v8, %v1875_v1  ;;  %v724_v51 = vsub.f32 %v1863_v8, %v1877_v23 }
 0x1a3   : > { %v1018_v59 = vmax.f32 %v986_v63, 0.0  ;;  %v1019_v24 = vmax.f32 %v987_v16, 0.0  ;;  %v731_v5 = vsub.f32 %v674_v10, %v1875_v1  ;;  %v732_v53 = vsub.f32 %v674_v10, %v1877_v23 }
 0x1a4   : > { %v1060_v12 = vmul.f32 %v1028_v0, %v831_v33  ;;  %v1061_v32 = vmul.f32 %v1029_v13, %v832_v52  ;;  %v855_v19 = vpop.permute.xlu2 %854  ;;  %v826_v37 = vmax.f32 %v794_v21, 0.0  ;;  %v1023_v44 = vmax.f32 %v991_v40, 0.0 }
 0x1a5   : > { %v2015_v20 = vmul.f32 %v1018_v59, %v1900_v41  ;;  %v2018_v58 = vmul.f32 %v1019_v24, %v1902_v27  ;;  %v763_v22 = vand.u32 2147483647, %v731_v5  ;;  %v764_v2 = vand.u32 2147483647, %v732_v53 }
 0x1a6   : > { %v1084_v26 = vpack.c.bf16 %v1060_v12, %v1058_v4  ;;  %v1085_v36 = vpack.c.bf16 %v1061_v32, %v1059_v35  ;;  %v721_v41 = vsub.f32 %v1861_v62, %v1875_v1  ;;  %v990_v27 = vsub.f32 1.0, %v958_v46 }
 0x1a7   : > { %v1080_v30 = vpack.c.bf16 %v2009_v45, %v2015_v20  ;;  %v1081_v29 = vpack.c.bf16 %v2012_v28, %v2018_v58  ;;  %v920_v57 = vsub.f32 %v855_v19, %v1885_v9  ;;  %v921_v60 = vsub.f32 %v855_v19, %v1887_v43 }
 0x1a8   : > { %1114 = vmatpush.bf16.msra.mxu0 %v1084_v26  ;;  %1128 = vmatpush.bf16.msra.mxu1 %v1085_v36  ;;  %v795_v56 = vsub.f32 1.0, %v763_v22  ;;  %v796_v14 = vsub.f32 1.0, %v764_v2  ;;  %v753_v61 = vand.u32 2147483647, %v721_v41  ;;  %v1022_v39 = vmax.f32 %v990_v27, 0.0 }
 0x1a9   : > { %v952_v42 = vand.u32 2147483647, %v920_v57  ;;  %v953_v25 = vand.u32 2147483647, %v921_v60  ;;  %v2092_v62 = vpack.c.bf16 %v1818_v34, %v1816_v50  ;;  %v754_v0 = vand.u32 2147483647, %v722_v47 }
 0x1aa   : > { %v827_v33 = vmax.f32 %v795_v56, 0.0  ;;  %v828_v52 = vmax.f32 %v796_v14, 0.0  ;;  %v755_v1 = vand.u32 2147483647, %v723_v6  ;;  %v756_v13 = vand.u32 2147483647, %v724_v51 }
 0x1ab   : > { %v871_v54 = vpop.permute.xlu1 %870  ;;  %v984_v23 = vsub.f32 1.0, %v952_v42  ;;  %v985_v15 = vsub.f32 1.0, %v953_v25  ;;  %v1054_v59 = vmul.f32 %v1022_v39, %v825_v48  ;;  %v1055_v24 = vmul.f32 %v1023_v44, %v826_v37 }
 0x1ac   : > { %v928_v38 = vsub.f32 %v871_v54, %v1885_v9  ;;  %v929_v7 = vsub.f32 %v871_v54, %v1887_v43  ;;  %v785_v12 = vsub.f32 1.0, %v753_v61  ;;  %v786_v32 = vsub.f32 1.0, %v754_v0 }
 0x1ad   : > { %v787_v50 = vsub.f32 1.0, %v755_v1  ;;  %v788_v34 = vsub.f32 1.0, %v756_v13  ;;  %v1016_v36 = vmax.f32 %v984_v23, 0.0  ;;  %v1017_v46 = vmax.f32 %v985_v15, 0.0 }
 0x1ae   : > { %v960_v18 = vand.u32 2147483647, %v928_v38  ;;  %v961_v17 = vand.u32 2147483647, %v929_v7  ;;  %v817_v2 = vmax.f32 %v785_v12, 0.0  ;;  %v818_v19 = vmax.f32 %v786_v32, 0.0 }
 0x1b0   : > { %v992_v63 = vsub.f32 1.0, %v960_v18  ;;  %v993_v16 = vsub.f32 1.0, %v961_v17  ;;  %1101 = vxpose.xlu0.c.b16.end [8/8] (narrow) %v2092_v62, 16 }
 0x1b2   : > { %v1024_v31 = vmax.f32 %v992_v63, 0.0  ;;  %v1025_v8 = vmax.f32 %v993_v16, 0.0 }
 0x1b3   : > { %v851_v10 = vpop.permute.xlu1 %850 }
 0x1b4   : > { %v918_v4 = vsub.f32 %v851_v10, %v1885_v9  ;;  %v919_v35 = vsub.f32 %v851_v10, %v1887_v43  ;;  %v1056_v5 = vmul.f32 %v1024_v31, %v827_v33  ;;  %v1057_v53 = vmul.f32 %v1025_v8, %v828_v52 }
 0x1b5   : > { %v819_v9 = vmax.f32 %v787_v50, 0.0  ;;  %v820_v43 = vmax.f32 %v788_v34, 0.0 }
 0x1b6   : > { %v950_v55 = vand.u32 2147483647, %v918_v4  ;;  %v951_v49 = vand.u32 2147483647, %v919_v35  ;;  %v1082_v11 = vpack.c.bf16 %v1056_v5, %v1054_v59  ;;  %v1083_v26 = vpack.c.bf16 %v1057_v53, %v1055_v24 }
 0x1b7   : > { %v1048_v41 = vmul.f32 %v1016_v36, %v819_v9  ;;  %v1049_v57 = vmul.f32 %v1017_v46, %v820_v43 }
 0x1b8   : > { %v982_v3 = vsub.f32 1.0, %v950_v55  ;;  %v983_v22 = vsub.f32 1.0, %v951_v49  ;;  %1115 = vmatpush.bf16.msra.mxu0 %v1082_v11  ;;  %1129 = vmatpush.bf16.msra.mxu1 %v1083_v26 }
 0x1ba   : > { %v1014_v21 = vmax.f32 %v982_v3, 0.0  ;;  %v1015_v48 = vmax.f32 %v983_v22, 0.0 }
 0x1bc   : > { %1116 = vmatpush.bf16.msra.mxu0 %v1080_v30  ;;  %1130 = vmatpush.bf16.msra.mxu1 %v1081_v29  ;;  %v1046_v27 = vmul.f32 %v1014_v21, %v817_v2  ;;  %v1047_v40 = vmul.f32 %v1015_v48, %v818_v19 }
 0x1be   : > { %v1078_v60 = vpack.c.bf16 %v1048_v41, %v1046_v27  ;;  %v1079_v54 = vpack.c.bf16 %v1049_v57, %v1047_v40 }
 0x1c0   : > { %1117 = vmatpush.bf16.msra.mxu0 %v1078_v60  ;;  %1131 = vmatpush.bf16.msra.mxu1 %v1079_v54 }
 0x1ec   : > { %v1102_v56 = vpop.trf.xlu0 }
 0x1ed   : > { %1118 = vmatmul.bf16.vlgmr.msra.gmra.mxu0 %v1102_v56  ;;  %1132 = vmatmul.bf16.vlgmr.msra.gmra.mxu1 %v1102_v56 }
 0x26a   : > { %v1119_v14 = vpop.f32.mrf.mxu0  ;;  %v1133_v45 = vpop.f32.mrf.mxu1 }
 0x26b   : > { %1146 = vst [vmem:[%s186_s23] sm:$0xff] %v1119_v14 }
 0x26c   : > { %1147 = vst [vmem:[%s186_s23 + $0x8] sm:$0xff] %v1133_v45 }
 0x272   : > { %v1121_v28 = vpop.f32.mrf.mxu0  ;;  %v1135_v20 = vpop.f32.mrf.mxu1 }
 0x273   : > { %1148 = vst [vmem:[%s186_s23 + $0x10] sm:$0xff] %v1121_v28 }
 0x274   : > { %1149 = vst [vmem:[%s186_s23 + $0x18] sm:$0xff] %v1135_v20 }
 0x275   : > { %1425 = shalt.err (!%p1422_p5)
}
 0x276   : > { %s1484_s11 = smov 256   ;;  %s1485_s18 = smov 16  }
 0x277   : > { %1277 = dma.vmem_to_hbm [thread:$0]  (%p1546_p4), %s1164_s29, 512, %s1166_s30, %s1151_s4, %s1484_s11, %s1484_s11, %s1485_s18  }
 0x278 PF: > { %p1283_p6 = scmp.ge.s32.totalorder %s1476_s17, 2  ;;  %s1180_s19 = sand.u32 1, %s1456_s12  }
 0x279   : > { %s1181_s21 = scalar_lea.sflag [#allocation3], %s1180_s19 }
 0x27a   : > { %p1280_p7 = pnand %p1283_p6, %p1553_p8 }
 0x27c   : > { %p1281_p9 = pneg %p1280_p7 }
 0x27e   : > { %1451 = dma.done.wait (%p1281_p9), %s1181_s21, 512  }
 0x27f   : > { %1453 = vsyncadd (%p1281_p9), %s1181_s21, 4294966784  ;;  %s16_s17 = sadd.s32 1, %s1476_s17   ;;  %s2093_s12 = smov %s1460_s13 }
 0x280   : > { %p13_p10 = scmp.ge.s32.totalorder %s16_s17, 4   ;;  %s2094_s13 = smov %s1464_s14 }
 0x281   : > { %s2095_s14 = smov %s1559_s25  ;;  %s2096_s15 = smov %s1472_s16 }
 0x282   : > { %s2097_s16 = smov %s2099_s20  ;;  %15 = sbr.rel (!%p13_p10) target bundleno = 4 (0x4), region = 72 }
 0x287   :  { %1187 = vsyncpa [#allocation3], 1 }
 0x288   :  { %1189 = vsyncpa [#allocation3 + $0x1], 1 }

</bundles_post_ra>
